<compile_context>
chip_gen: v7x
topology: tpu7x:2x2x1
jax: 0.10.0
libtpu: 0.0.40
codegen_flags: <defaults>
</compile_context>

<pallas_src>
import functools

import jax
import jax.numpy as jnp
from jax.experimental import pallas as pl
from jax.experimental.pallas import tpu as pltpu


def _attention_output_kernel(x_ref, res_ref, w_ref, b_ref, g_ref, beta_ref, o_ref, *, eps):
    """One (tm, H) row tile: dense -> (+bias) -> (+residual) -> LayerNorm."""
    # MXU GEMM: native-dtype operands, f32 accumulation. w_ref is (H_out, H_in) (PyTorch
    # Linear layout); contract x's axis 1 with w's axis 1 (transposed RHS on the MXU).
    y = jax.lax.dot_general(
        x_ref[...], w_ref[...],
        dimension_numbers=(((1,), (1,)), ((), ())),
        preferred_element_type=jnp.float32,
    )

    # Epilogue in f32: bias, dropout (identity in eval mode), residual add.
    y = y + b_ref[...].astype(jnp.float32) + res_ref[...].astype(jnp.float32)

    # LayerNorm over hidden: one pass for both statistics (mean and E[y^2]).
    inv_h = 1.0 / y.shape[-1]
    mean = jnp.sum(y, axis=-1, keepdims=True) * inv_h
    mean_sq = jnp.sum(y * y, axis=-1, keepdims=True) * inv_h
    var = jnp.maximum(mean_sq - mean * mean, 0.0)   # clamp: E[y^2]-mean^2 can dip <0 in f32
    inv = jax.lax.rsqrt(var + eps)                  # EUP op — off the VALU critical path
    out = (y - mean) * inv * g_ref[...].astype(jnp.float32) + beta_ref[...].astype(jnp.float32)
    o_ref[...] = out.astype(o_ref.dtype)


def _pick_row_tile(N, H, act_itemsize):
    """Row tile from a VMEM budget, aligned to MXU (256) / sublane (8) granules."""
    budget = 8 * 1024 * 1024                       # activation-tile budget per grid step
    per_row = 3 * H * act_itemsize * 2             # (x + res + out), double-buffered
    tm = max(8, budget // per_row)
    if tm >= 256:
        tm = min(1024, (tm // 256) * 256)          # MXU systolic granule (v6e/v7x)
    else:
        tm = max(8, (tm // 8) * 8)                 # sublane granule
    if tm >= N:
        # Small inputs: still keep >=2 grid steps when layout-legal so both v7x
        # TensorCores get work and the DMA pipeline has something to overlap.
        if N >= 16 and N % 8 == 0:
            return max(8, ((N // 2) // 8) * 8)
        return N                                    # block == full dim is always legal
    return tm


def attention_output(context_layer, input_tensor, weight, bias, gamma, beta,
                     *, eps=1e-12, row_tile=None):
    """context_layer/input_tensor: [B, S, H]; weight: [H, H] PyTorch Linear layout (out, in)."""
    B, S, H = context_layer.shape
    N = B * S
    x2 = context_layer.reshape(N, H)
    r2 = input_tensor.reshape(N, H)
    b2 = bias.reshape(1, H)
    g2 = gamma.reshape(1, H)
    be2 = beta.reshape(1, H)

    act_itemsize = jnp.dtype(x2.dtype).itemsize
    w_itemsize = jnp.dtype(weight.dtype).itemsize
    out_dtype = context_layer.dtype

    tm = row_tile if row_tile is not None else _pick_row_tile(N, H, act_itemsize)
    tm = min(tm, N)
    grid = (pl.cdiv(N, tm),)

    # Explicit VMEM limit: activations double-buffered, constant-index operands single-buffered.
    vmem_needed = (
        2 * 2 * tm * H * act_itemsize                       # x + residual tiles
        + 2 * tm * H * jnp.dtype(out_dtype).itemsize        # output tile
        + H * H * w_itemsize                                # weight (Buffered(1))
        + 3 * H * 4                                         # bias / gamma / beta
    )
    vmem_limit = int(min(112 * 1024 * 1024, max(32 * 1024 * 1024, 2 * vmem_needed)))

    cost = pl.CostEstimate(
        flops=2 * N * H * H,
        transcendentals=0,
        bytes_accessed=act_itemsize * (3 * N * H) + w_itemsize * H * H,
    )

    def _const_spec(shape):
        # Constant index_map -> nothing to double-buffer; halve its VMEM footprint.
        return pl.BlockSpec(shape, lambda i: (0, 0), pipeline_mode=pl.Buffered(1))

    out2 = pl.pallas_call(
        functools.partial(_attention_output_kernel, eps=eps),
        out_shape=jax.ShapeDtypeStruct((N, H), out_dtype),
        grid_spec=pltpu.PrefetchScalarGridSpec(
            num_scalar_prefetch=0,
            grid=grid,
            in_specs=[
                pl.BlockSpec((tm, H), lambda i: (i, 0)),    # context tokens
                pl.BlockSpec((tm, H), lambda i: (i, 0)),    # residual tokens
                _const_spec((H, H)),                        # dense weight, (out, in) layout
                _const_spec((1, H)),                        # dense bias
                _const_spec((1, H)),                        # LayerNorm gamma
                _const_spec((1, H)),                        # LayerNorm beta
            ],
            out_specs=pl.BlockSpec((tm, H), lambda i: (i, 0)),
        ),
        compiler_params=pltpu.CompilerParams(
            dimension_semantics=("parallel",),
            vmem_limit_bytes=vmem_limit,
        ),
        cost_estimate=cost,
    )(x2, r2, weight, b2, g2, be2)

    return out2.reshape(B, S, H)


def _reference(context_layer, input_tensor, weight, bias, gamma, beta, eps=1e-12):
    y = jnp.einsum("bsh,oh->bso", context_layer, weight) + bias
    y = y + input_tensor
    mean = jnp.mean(y, axis=-1, keepdims=True)
    var = jnp.mean((y - mean) ** 2, axis=-1, keepdims=True)
    return (y - mean) * jax.lax.rsqrt(var + eps) * gamma + beta


if __name__ == "__main__":
    # Small config: batch=2, seq=8, hidden=32
    B, S, H = 2, 8, 32
    eps = 1e-12

    key = jax.random.PRNGKey(0)
    k1, k2, k3, k4 = jax.random.split(key, 4)

    context_layer = jax.random.normal(k1, (B, S, H), dtype=jnp.float32)
    input_tensor = jax.random.normal(k2, (B, S, H), dtype=jnp.float32)

    # Deterministic parameter init (nn.Linear-style scale), LayerNorm gamma=1, beta=0.
    weight = jax.random.normal(k3, (H, H), dtype=jnp.float32) * (1.0 / jnp.sqrt(H))
    bias = jax.random.normal(k4, (H,), dtype=jnp.float32) * 0.01
    gamma = jnp.ones((H,), dtype=jnp.float32)
    beta = jnp.zeros((H,), dtype=jnp.float32)

    out = attention_output(context_layer, input_tensor, weight, bias, gamma, beta, eps=eps)
    out = jax.block_until_ready(out)

    ref = _reference(context_layer, input_tensor, weight, bias, gamma, beta, eps=eps)
    assert out.shape == (B, S, H)
    assert jnp.allclose(out, ref, atol=1e-5, rtol=1e-5), "mismatch vs reference"

    print("KERNEL_OK")
</pallas_src>

<mosaic_0001>
module attributes {stable_mosaic.version = 11 : i64} {
  func.func @_attention_output_kernel(%arg0: i32, %arg1: memref<8x32xf32, #tpu.memory_space<vmem>>, %arg2: memref<8x32xf32, #tpu.memory_space<vmem>>, %arg3: memref<32x32xf32, #tpu.memory_space<vmem>>, %arg4: memref<1x32xf32, #tpu.memory_space<vmem>>, %arg5: memref<1x32xf32, #tpu.memory_space<vmem>>, %arg6: memref<1x32xf32, #tpu.memory_space<vmem>>, %arg7: memref<8x32xf32, #tpu.memory_space<vmem>>) attributes {dimension_semantics = [#tpu.dimension_semantics<parallel>], iteration_bounds = array<i64: 2>, scalar_prefetch = 0 : i64, scratch_operands = 0 : i64, tpu.core_type = #tpu.core_type<tc>, window_params = [{transform_indices = @transform_0, window_bounds = array<i64: 8, 32>}, {transform_indices = @transform_1, window_bounds = array<i64: 8, 32>}, {pipeline_mode = #tpu.pipeline_mode<synchronous>, transform_indices = @transform_2, window_bounds = array<i64: 32, 32>}, {pipeline_mode = #tpu.pipeline_mode<synchronous>, transform_indices = @transform_3, window_bounds = array<i64: 1, 32>}, {pipeline_mode = #tpu.pipeline_mode<synchronous>, transform_indices = @transform_4, window_bounds = array<i64: 1, 32>}, {pipeline_mode = #tpu.pipeline_mode<synchronous>, transform_indices = @transform_5, window_bounds = array<i64: 1, 32>}, {transform_indices = @transform_6, window_bounds = array<i64: 8, 32>}]} {
    %c0 = arith.constant 0 : index
    %c0_0 = arith.constant 0 : index
    %0 = vector.load %arg1[%c0, %c0_0] : memref<8x32xf32, #tpu.memory_space<vmem>>, vector<8x32xf32>
    %c0_1 = arith.constant 0 : index
    %c0_2 = arith.constant 0 : index
    %1 = vector.load %arg3[%c0_1, %c0_2] : memref<32x32xf32, #tpu.memory_space<vmem>>, vector<32x32xf32>
    %cst = arith.constant dense<0.000000e+00> : vector<8x32xf32>
    %2 = tpu.matmul %0, %1, %cst {dimension_numbers = #tpu.dot_dimension_numbers<[1], [1], [0], [0], [0, 0, 1, 0], [], []>} : vector<8x32xf32>, vector<32x32xf32>, vector<8x32xf32> -> vector<8x32xf32>
    %c0_3 = arith.constant 0 : index
    %c0_4 = arith.constant 0 : index
    %3 = vector.load %arg4[%c0_3, %c0_4] : memref<1x32xf32, #tpu.memory_space<vmem>>, vector<1x32xf32>
    %4 = vector.broadcast %3 : vector<1x32xf32> to vector<8x32xf32>
    %5 = arith.addf %2, %4 : vector<8x32xf32>
    %c0_5 = arith.constant 0 : index
    %c0_6 = arith.constant 0 : index
    %6 = vector.load %arg2[%c0_5, %c0_6] : memref<8x32xf32, #tpu.memory_space<vmem>>, vector<8x32xf32>
    %7 = arith.addf %5, %6 : vector<8x32xf32>
    %cst_7 = arith.constant dense<0.000000e+00> : vector<8xf32>
    %8 = vector.multi_reduction <add>, %7, %cst_7 [1] : vector<8x32xf32> to vector<8xf32>
    %9 = vector.shape_cast %8 : vector<8xf32> to vector<8x1xf32>
    %cst_8 = arith.constant 3.125000e-02 : f32
    %10 = vector.broadcast %cst_8 : f32 to vector<8x1xf32>
    %11 = arith.mulf %9, %10 : vector<8x1xf32>
    %12 = arith.mulf %7, %7 : vector<8x32xf32>
    %cst_9 = arith.constant dense<0.000000e+00> : vector<8xf32>
    %13 = vector.multi_reduction <add>, %12, %cst_9 [1] : vector<8x32xf32> to vector<8xf32>
    %14 = vector.shape_cast %13 : vector<8xf32> to vector<8x1xf32>
    %cst_10 = arith.constant 3.125000e-02 : f32
    %15 = vector.broadcast %cst_10 : f32 to vector<8x1xf32>
    %16 = arith.mulf %14, %15 : vector<8x1xf32>
    %17 = arith.mulf %11, %11 : vector<8x1xf32>
    %18 = arith.subf %16, %17 : vector<8x1xf32>
    %cst_11 = arith.constant 0.000000e+00 : f32
    %19 = vector.broadcast %cst_11 : f32 to vector<8x1xf32>
    %20 = arith.maximumf %18, %19 : vector<8x1xf32>
    %cst_12 = arith.constant 9.99999996E-13 : f32
    %21 = vector.broadcast %cst_12 : f32 to vector<8x1xf32>
    %22 = arith.addf %20, %21 : vector<8x1xf32>
    %23 = math.rsqrt %22 : vector<8x1xf32>
    %24 = vector.broadcast %11 : vector<8x1xf32> to vector<8x32xf32>
    %25 = arith.subf %7, %24 : vector<8x32xf32>
    %26 = vector.broadcast %23 : vector<8x1xf32> to vector<8x32xf32>
    %27 = arith.mulf %25, %26 : vector<8x32xf32>
    %c0_13 = arith.constant 0 : index
    %c0_14 = arith.constant 0 : index
    %28 = vector.load %arg5[%c0_13, %c0_14] : memref<1x32xf32, #tpu.memory_space<vmem>>, vector<1x32xf32>
    %29 = vector.broadcast %28 : vector<1x32xf32> to vector<8x32xf32>
    %30 = arith.mulf %27, %29 : vector<8x32xf32>
    %c0_15 = arith.constant 0 : index
    %c0_16 = arith.constant 0 : index
    %31 = vector.load %arg6[%c0_15, %c0_16] : memref<1x32xf32, #tpu.memory_space<vmem>>, vector<1x32xf32>
    %32 = vector.broadcast %31 : vector<1x32xf32> to vector<8x32xf32>
    %33 = arith.addf %30, %32 : vector<8x32xf32>
    %c0_17 = arith.constant 0 : index
    %c0_18 = arith.constant 0 : index
    %34 = vector.load %arg7[%c0_17, %c0_18] : memref<8x32xf32, #tpu.memory_space<vmem>>, vector<8x32xf32>
    tpu.vector_store %arg7[%c0_17, %c0_18], %33 {strides = array<i32>} : memref<8x32xf32, #tpu.memory_space<vmem>>, vector<8x32xf32>,
    return
  }
  func.func @transform_0(%arg0: i32) -> (i32, i32) {
    %c0_i32 = arith.constant 0 : i32
    %c0_i32_0 = arith.constant 0 : i32
    return %arg0, %c0_i32 : i32, i32
  }
  func.func @transform_1(%arg0: i32) -> (i32, i32) {
    %c0_i32 = arith.constant 0 : i32
    %c0_i32_0 = arith.constant 0 : i32
    return %arg0, %c0_i32 : i32, i32
  }
  func.func @transform_2(%arg0: i32) -> (i32, i32) {
    %c0_i32 = arith.constant 0 : i32
    %c0_i32_0 = arith.constant 0 : i32
    %c0_i32_1 = arith.constant 0 : i32
    return %c0_i32, %c0_i32_0 : i32, i32
  }
  func.func @transform_3(%arg0: i32) -> (i32, i32) {
    %c0_i32 = arith.constant 0 : i32
    %c0_i32_0 = arith.constant 0 : i32
    %c0_i32_1 = arith.constant 0 : i32
    return %c0_i32, %c0_i32_0 : i32, i32
  }
  func.func @transform_4(%arg0: i32) -> (i32, i32) {
    %c0_i32 = arith.constant 0 : i32
    %c0_i32_0 = arith.constant 0 : i32
    %c0_i32_1 = arith.constant 0 : i32
    return %c0_i32, %c0_i32_0 : i32, i32
  }
  func.func @transform_5(%arg0: i32) -> (i32, i32) {
    %c0_i32 = arith.constant 0 : i32
    %c0_i32_0 = arith.constant 0 : i32
    %c0_i32_1 = arith.constant 0 : i32
    return %c0_i32, %c0_i32_0 : i32, i32
  }
  func.func @transform_6(%arg0: i32) -> (i32, i32) {
    %c0_i32 = arith.constant 0 : i32
    %c0_i32_0 = arith.constant 0 : i32
    return %arg0, %c0_i32 : i32, i32
  }
}

</mosaic_0001>

<bundles_post_ra>
// kernel: tpu_custom_call.1
= control target key start
LH: loop header
LB: loop body
LE: loop exit
PB: predicated region body
PF: predicated region fallthrough
CT: control target
= control target key end

     0   :  { %s1143_s0 = inlined_call_operand.hbm [shape: f32[16,32], index: 0, kind: input, shape index: {}]   ;;  %s1144_s1 = inlined_call_operand.hbm [shape: f32[16,32], index: 1, kind: input, shape index: {}]   ;;  %s1145_s2 = inlined_call_operand.hbm [shape: f32[32,32], index: 2, kind: input, shape index: {}]   ;;  %s1146_s3 = inlined_call_operand.vmem [shape: f32[1,32], index: 3, kind: input, shape index: {}]   ;;  %s1147_s4 = inlined_call_operand.vmem [shape: f32[1,32], index: 4, kind: input, shape index: {}]   ;;  %s1148_s5 = inlined_call_operand.vmem [shape: f32[1,32], index: 5, kind: input, shape index: {}]   ;;  %s1149_s6 = inlined_call_operand.hbm [shape: f32[16,32], index: 6, kind: output, shape index: {}]  }
   0x1   :  { %1155 = sst [smem:[#allocation15_spill]] %s1145_s2 }
   0x2   :  { %11 = vsyncpa [#allocation3], 0 }
   0x3   :  { %13 = vsyncpa [#allocation3 + $0x1], 0 }
   0x4   :  { %14 = vsyncpa [#allocation6], 0 }
   0x5   :  { %16 = vsyncpa [#allocation6 + $0x1], 0 }
   0x6   :  { %17 = vsyncpa [#allocation4], 0 }
   0x7   :  { %19 = vsyncpa [#allocation4 + $0x1], 0  ;;  %s893_s21 = smov 0   ;;  %s895_s22 = smov 0  }
   0x8   :  { %s897_s23 = smov 0   ;;  %s899_s24 = smov 0  }
   0x9 LB: > { %1156 = sst [smem:[#allocation13_spill]] %s843_s23  ;;  %s914_s25 = sadd.s32 4294967295, %s847_s24   ;;  %s847_s24 = sphi %s899_s24, %s1178_s24   ;;  %s843_s23 = sphi %s897_s23, %s1177_s23   ;;  %s839_s22 = sphi %s895_s22, %s1176_s22   ;;  %s835_s21 = sphi %s893_s21, %s1175_s21  }
   0xa   : > { %s567_s26 = sadd.s32 4294967294, %s847_s24   ;;  %p45_p0 = scmp.ne.s32.totalorder %s839_s22, %s835_s21 }
   0xb   : > { %p1150_p1 = scmp.eq.s32.totalorder %s914_s25, 0  ;;  %p185_p3 = scmp.eq.s32.totalorder %s567_s26, 1 }
   0xc   : > { %p568_p5 = scmp.ge.s32.totalorder %s847_s24, 1  ;;  %p192_p7 = scmp.lt.s32.totalorder %s847_s24, 3 }
   0xd   : > { %p923_p4 = por %p1150_p1, %p45_p0  ;;  %p928_p6 = por %p185_p3, %p45_p0 }
   0xe   : > { %p933_p8 = pnand %p568_p5, %p192_p7  ;;  %s849_s30 = smov [#allocation7]  }
   0xf   : > { %s1157_s27 = scalar_select %p923_p4, 1, 0 }
  0x10   : > { %s1158_s28 = scalar_select %p928_p6, 1, 0 }
  0x11   : > { %s1159_s29 = scalar_select %p933_p8, 1, 0 }
  0x12   : > { %s204_s7 = sshll.u32 %s849_s30, 4  ;;  %p626_p9 = pneg %p933_p8  ;;  %s937_s7 = int_to_ptr.vmem [resolvable:$true] %s204_s7 }
  0x13   : > { %s949_s9 = sadd.s32 1, %s847_s24   ;;  %s32_s10 = sadd.s32 1, %s843_s23 }
  0x14   : > { %p944_p11 = pnand %p626_p9, %p1150_p1  ;;  %s29_s11 = ssub.s32 %s847_s24, %s949_s9 }
  0x15   : > { %s1161_s2 = sld [smem:[#allocation15_spill]] }
  0x16   : > { %p687_p13 = pneg %p944_p11 }
  0x1b   : > { %s685_s14 = scalar_lea.hbm %s1161_s2, 512 }
  0x1c   : > { %p686_p12 = scmp.ne.s32.totalorder %s1161_s2, %s685_s14  ;;  %p692_p5 = scmp.lt.u32.totalorder %s685_s14, %s1161_s2 }
  0x1e   : > { %p688_p0 = pnand %p687_p13, %p686_p12 }
  0x20   : > { %p689_p3 = pneg %p688_p0 }
  0x22   : > { %p694_p7 = pnand %p692_p5, %p689_p3 }
  0x24   : > { %697 = shalt.err (!%p694_p7)
}
  0x25   : > { %s698_s19 = scalar_lea.vmem %s937_s7, 512  ;;  %p706_p2 = scmp.lt.s32.totalorder %s937_s7, %s937_s7 }
  0x26   : > { %p699_p9 = scmp.ne.s32.totalorder %s937_s7, %s698_s19  ;;  %p707_p6 = scmp.lt.s32.totalorder %s698_s19, %s698_s19 }
  0x28   : > { %p701_p10 = pnand %p699_p9, %p687_p13  ;;  %p708_p4 = por %p707_p6, %p706_p2 }
  0x2a   : > { %p702_p1 = pneg %p701_p10 }
  0x2c   : > { %p709_p8 = pnand %p708_p4, %p702_p1 }
  0x2e   : > { %712 = shalt.err (!%p709_p8)
}
  0x2f   : > { %s850_s20 = smov 128   ;;  %s851_s26 = smov 8  }
  0x30   : > { %629 = dma.hbm_to_vmem [thread:$0]  (!%p944_p11), %s1161_s2, 512, %s937_s7, [#allocation6], %s850_s20, %s850_s20, %s851_s26  }
  0x31   : > { %p30_p2 = scmp.eq.s32.totalorder %s29_s11, 0  ;;  %p39_p1 = scmp.ne.s32.totalorder %s843_s23, %s839_s22 }
  0x32   : > { %p40_p4 = scmp.eq.s32.totalorder %s847_s24, 0  ;;  %p642_p6 = scmp.lt.s32.totalorder %s847_s24, 2 }
  0x33   : > { %s980_s13 = scalar_select %p30_p2, %s843_s23, %s32_s10  }
  0x34   : > { %p41_p8 = por %p40_p4, %p39_p1  ;;  %p1163_p10 = scmp.eq.s32.totalorder %s914_s25, 1 }
  0x35   : > { %1162 = sst [smem:[#allocation14_spill]] %s980_s13  ;;  %s227_s15 = sand.u32 1, %s843_s23  }
  0x36   : > { %p984_p12 = por %p1163_p10, %p39_p1  ;;  %s572_s16 = sshll.u32 %s847_s24, 7 }
  0x37   : > { %s990_s17 = sshll.u32 %s227_s15, 3  ;;  %s995_s7 = scalar_lea.hbm %s1143_s0, %s572_s16 }
  0x38   : > { %s1164_s14 = scalar_select %p984_p12, 1, 0 }
  0x39   : > { %s231_s10 = scalar_lea.vmem [#allocation2], %s990_s17  ;;  %p998_p11 = pnand %p642_p6, %p41_p8 }
  0x3a   : > { %s238_s11 = sshll.u32 %s231_s10, 4  ;;  %s1007_s30 = scalar_lea.hbm %s1144_s1, %s572_s16  ;;  %s1002_s11 = int_to_ptr.vmem [resolvable:$true] %s238_s11 }
  0x3b   : > { %s228_s12 = scalar_lea.sflag [#allocation3], %s227_s15  ;;  %s713_s8 = scalar_lea.hbm %s995_s7, 128 }
  0x3c   : > { %p714_p13 = scmp.ne.s32.totalorder %s995_s7, %s713_s8  ;;  %p715_p0 = pneg %p998_p11 }
  0x3d   : > { %s718_s2 = scalar_lea.hbm %s1143_s0, 256  ;;  %p719_p7 = scmp.lt.u32.totalorder %s995_s7, %s1143_s0 }
  0x3e   : > { %p716_p3 = pnand %p715_p0, %p714_p13  ;;  %p720_p9 = scmp.lt.u32.totalorder %s718_s2, %s713_s8 }
  0x3f   : > { %p722_p1 = scmp.lt.u32.totalorder %s713_s8, %s995_s7 }
  0x40   : > { %p717_p5 = pneg %p716_p3  ;;  %p721_p2 = por %p720_p9, %p719_p7 }
  0x42   : > { %p723_p4 = por %p722_p1, %p721_p2 }
  0x44   : > { %p724_p6 = pnand %p723_p4, %p717_p5 }
  0x46   : > { %727 = shalt.err (!%p724_p6)
}
  0x47   : > { %s728_s15 = scalar_lea.vmem %s1002_s11, 128  ;;  %s852_s16 = smov [#allocation2]  }
  0x48   : > { %p729_p8 = scmp.ne.s32.totalorder %s1002_s11, %s728_s15  ;;  %s733_s20 = sshll.u32 %s852_s16, 4  ;;  %s734_s20 = int_to_ptr.vmem [resolvable:$false] %s733_s20 }
  0x49   : > { %s735_s23 = scalar_lea.vmem %s734_s20, 256  ;;  %p736_p3 = scmp.lt.s32.totalorder %s1002_s11, %s734_s20 }
  0x4a   : > { %p731_p10 = pnand %p729_p8, %p715_p0  ;;  %p737_p7 = scmp.lt.s32.totalorder %s735_s23, %s728_s15 }
  0x4c   : > { %p732_p13 = pneg %p731_p10  ;;  %p738_p9 = por %p737_p7, %p736_p3 }
  0x4e   : > { %p739_p2 = pnand %p738_p9, %p732_p13 }
  0x50   : > { %742 = shalt.err (!%p739_p2)
}
  0x51   : > { %633 = dma.hbm_to_vmem [thread:$0]  (!%p998_p11), %s995_s7, 128, %s1002_s11, %s228_s12  }
  0x52   : > { %s245_s2 = sand.u32 1, %s847_s24   ;;  %s249_s13 = scalar_lea.vmem [#allocation5], %s990_s17 }
  0x53   : > { %s256_s26 = sshll.u32 %s249_s13, 4  ;;  %s246_s8 = scalar_lea.sflag [#allocation6], %s245_s2  ;;  %s257_s26 = int_to_ptr.vmem [resolvable:$true] %s256_s26 }
  0x54   : > { %s743_s18 = scalar_lea.hbm %s1007_s30, 128  ;;  %s748_s16 = scalar_lea.hbm %s1144_s1, 256 }
  0x55   : > { %p744_p5 = scmp.ne.s32.totalorder %s1007_s30, %s743_s18  ;;  %p749_p6 = scmp.lt.u32.totalorder %s1007_s30, %s1144_s1 }
  0x56   : > { %p750_p8 = scmp.lt.u32.totalorder %s748_s16, %s743_s18  ;;  %p752_p13 = scmp.lt.u32.totalorder %s743_s18, %s1007_s30 }
  0x57   : > { %p746_p1 = pnand %p744_p5, %p715_p0 }
  0x58   : > { %p751_p10 = por %p750_p8, %p749_p6 }
  0x59   : > { %p747_p4 = pneg %p746_p1 }
  0x5a   : > { %p753_p3 = por %p752_p13, %p751_p10 }
  0x5c   : > { %p754_p7 = pnand %p753_p3, %p747_p4 }
  0x5e   : > { %757 = shalt.err (!%p754_p7)
}
  0x5f   : > { %s758_s17 = scalar_lea.vmem %s257_s26, 128  ;;  %s853_s7 = smov [#allocation5]  }
  0x60   : > { %p759_p9 = scmp.ne.s32.totalorder %s257_s26, %s758_s17  ;;  %s763_s11 = sshll.u32 %s853_s7, 4  ;;  %s764_s11 = int_to_ptr.vmem [resolvable:$false] %s763_s11 }
  0x61   : > { %s765_s12 = scalar_lea.vmem %s764_s11, 256  ;;  %p766_p1 = scmp.lt.s32.totalorder %s257_s26, %s764_s11 }
  0x62   : > { %p761_p2 = pnand %p759_p9, %p715_p0  ;;  %p767_p12 = scmp.lt.s32.totalorder %s765_s12, %s758_s17 }
  0x64   : > { %p762_p5 = pneg %p761_p2  ;;  %p768_p6 = por %p767_p12, %p766_p1 }
  0x66   : > { %p769_p8 = pnand %p768_p6, %p762_p5 }
  0x68   : > { %772 = shalt.err (!%p769_p8)
}
  0x69   : > { %636 = dma.hbm_to_vmem [thread:$0]  (!%p998_p11), %s1007_s30, 128, %s257_s26, %s246_s8  }
  0x6a   : > { %p1166_p4 = scmp.ne.s32.totalorder %s1159_s29, 0 }
  0x6b   : > { %s1058_s2 = sand.u32 (!%p1166_p4), 1, %s839_s22   ;;  %p1167_p12 = scmp.ne.s32.totalorder (!%p1166_p4), %s1157_s27, 0 }
  0x6c   : > { %265 = sbr.rel (%p1166_p4) target bundleno = 542 (0x21e), region = 44  ;;  %s1061_s13 = sshll.u32 (!%p1166_p4), %s1058_s2, 3 }
  0x6d   : > { %s268_s18 = scalar_lea.sflag (!%p1166_p4), [#allocation3], %s1058_s2  ;;  %s271_s10 = scalar_lea.vmem (!%p1166_p4), [#allocation2], %s1061_s13 }
  0x73   : > { %818 = dma.done.wait (%p1167_p12), %s268_s18, 128  }
  0x74   : > { %820 = vsyncadd (%p1167_p12), %s268_s18, 4294967168  ;;  %s276_s29 = sand.u32 1, %s914_s25   ;;  %s280_s30 = scalar_lea.vmem [#allocation5], %s1061_s13 }
  0x75   : > { %s277_s19 = scalar_lea.sflag [#allocation6], %s276_s29 }
  0x76   : > { %822 = dma.done.wait (%p1167_p12), %s277_s19, 128  }
  0x77   : > { %824 = vsyncadd (%p1167_p12), %s277_s19, 4294967168  ;;  %p1168_p11 = scmp.eq.s32.totalorder %s914_s25, 0 }
  0x79   : > { %826 = dma.done.wait (%p1168_p11), [#allocation6], 512   ;;  %p1169_p0 = pmov %p1168_p11 }
  0x7a   : > { %v854_v0 = vmov 0.0|0.0   ;;  %vm855_vm0 = vmmov 0   ;;  %v856_v1 = vmov 0.0   ;;  %vm330_vm1 = vcmask 261120   ;;  %v319_v2 = vld [vmem:[#allocation7] sm:$0xff]  ;;  %v320_v3 = vld [vmem:[#allocation7 + $0x8] sm:$0xff] }
  0x7b   : > { %828 = vsyncadd (%p1169_p0), [#allocation6], 4294966784  ;;  %608 = vmatprep.subr.bf16.mxu0 %v854_v0  ;;  %605 = vmatprep.mubr.msk.f32.mxu0 %vm855_vm0, %v856_v1  ;;  %v609_v4 = vpack.c.bf16 %v320_v3, %v319_v2  ;;  %v321_v5 = vld [vmem:[#allocation7 + $0x10] sm:$0xff]  ;;  %v322_v6 = vld [vmem:[#allocation7 + $0x18] sm:$0xff]  ;;  %s589_s23 = sshll.u32 %s914_s25, 7  ;;  %s317_s17 = scalar_lea.vmem [#allocation8], %s1061_s13 }
  0x7c   : > { %vm610_vm2 = vmpackc.low %vm330_vm1, %vm330_vm1  ;;  %v613_v7 = vpack.c.bf16 %v322_v6, %v321_v5  ;;  %v318_v8 = vld [vmem:[%s271_s10] sm:$0xff]  ;;  %v416_v11 = vld [vmem:[%s280_s30] sm:$0xff]  ;;  %s465_s7 = sshll.u32 %s317_s17, 4  ;;  %s1098_s18 = scalar_lea.hbm %s1149_s6, %s589_s23  ;;  %s1100_s7 = int_to_ptr.vmem [resolvable:$true] %s465_s7 }
  0x7d   : > { %611 = vmatpush3.bf16.xpose.msk.msra.mxu0 %vm610_vm2, %v609_v4  ;;  %v580_v9 = vld [vmem:[%s1146_s3] ss:$0 sm:$0xff]  ;;  %s452_s10 = scalar_lea.sflag [#allocation4], %s1058_s2  ;;  %s773_s29 = scalar_lea.vmem %s1100_s7, 128 }
  0x7e   : > { %612 = vmatprep.subr.bf16.mxu0 %v854_v0  ;;  %v586_v28 = vld [vmem:[%s1147_s4] ss:$0 sm:$0xff]  ;;  %p774_p10 = scmp.ne.s32.totalorder %s1100_s7, %s773_s29  ;;  %p1170_p13 = scmp.ne.s32.totalorder %s1164_s14, 0 }
  0x7f   : > { %v587_v30 = vld [vmem:[%s1148_s5] ss:$0 sm:$0xff]  ;;  %s857_s25 = smov [#allocation8]  }
  0x80   : > { %p775_p3 = pnand %p774_p10, %p1170_p13  ;;  %s777_s13 = sshll.u32 %s857_s25, 4  ;;  %s778_s13 = int_to_ptr.vmem [resolvable:$false] %s777_s13 }
  0x81   : > { %s779_s19 = scalar_lea.vmem %s778_s13, 256  ;;  %p780_p9 = scmp.lt.s32.totalorder %s1100_s7, %s778_s13 }
  0x82   : > { %p776_p7 = pneg %p775_p3  ;;  %p781_p2 = scmp.lt.s32.totalorder %s779_s19, %s773_s29 }
  0x84   : > { %p782_p5 = por %p781_p2, %p780_p9 }
  0x85   : > { %615 = vmatpush3.bf16.xpose.msk.msra.mxu0 %vm610_vm2, %v613_v7 }
  0x86   : > { %p783_p1 = pnand %p782_p5, %p776_p7 }
  0x8c   : > { %606 = vmatmul.mubr.msk.f32.vlgmr.msra.gmra.mrb[0].mxu0 %vm330_vm1, %v318_v8 }
 0x15f   : > { %v412_v10 = vpop.f32.mrb[0].mxu0 }
 0x160   : > { %v413_v12 = vadd.f32 %v580_v9, %v412_v10  ;;  %v607_v13 = vpop.f32.mrb[1].mxu0 }
 0x162   : > { %v417_v14 = vadd.f32 %v416_v11, %v413_v12 }
 0x164   : > { %v418_v15 = vsel %vm330_vm1, %v417_v14, 0.0  ;;  %v422_v16 = vmul.f32 %v417_v14, %v417_v14 }
 0x165   : > { %419 = vadd.xlane.f32.xlu0 %v418_v15 }
 0x166   : > { %v423_v17 = vsel %vm330_vm1, %v422_v16, 0.0 }
 0x169   : > { %424 = vadd.xlane.f32.xlu0 %v423_v17 }
 0x1f2   : > { %v420_v18 = vpop.xlane.xlu0 %419 }
 0x1f3   : > { %v421_v19 = vmul.f32 0.03125, %v420_v18 }
 0x1f5   : > { %v427_v21 = vmul.f32 %v421_v19, %v421_v19  ;;  %v432_v26 = vsub.f32 %v417_v14, %v421_v19 }
 0x1f6   : > { %v425_v20 = vpop.xlane.xlu0 %424 }
 0x1f7   : > { %v426_v22 = vmul.f32 0.03125, %v425_v20 }
 0x1f9   : > { %v428_v23 = vsub.f32 %v426_v22, %v427_v21 }
 0x1fb   : > { %v429_v24 = vmax.f32 %v428_v23, 0.0 }
 0x1fd   : > { %v430_v25 = vadd.f32 1e-12, %v429_v24 }
 0x1ff   : > { %683 = vrsqrt.f32 %v430_v25 }
 0x209   : > { %v684_v27 = vpop.eup %683 }
 0x20a   : > { %v433_v29 = vmul.f32 %v684_v27, %v432_v26 }
 0x20c   : > { %v441_v31 = vmul.f32 %v586_v28, %v433_v29 }
 0x20e   : > { %v449_v32 = vadd.f32 %v587_v30, %v441_v31 }
 0x210   : > { %450 = vst.msk [vmem:[%s317_s17] sm:$0xff] %vm330_vm1, %v449_v32 }
 0x211   : > { %786 = shalt.err (!%p783_p1)
}
 0x212   : > { %s787_s2 = scalar_lea.hbm %s1098_s18, 128  ;;  %s791_s26 = scalar_lea.hbm %s1149_s6, 256 }
 0x213   : > { %p788_p6 = scmp.ne.s32.totalorder %s1098_s18, %s787_s2  ;;  %p792_p12 = scmp.lt.u32.totalorder %s1098_s18, %s1149_s6 }
 0x214   : > { %p793_p11 = scmp.lt.u32.totalorder %s791_s26, %s787_s2  ;;  %p795_p10 = scmp.lt.u32.totalorder %s787_s2, %s1098_s18 }
 0x215   : > { %p789_p8 = pnand %p788_p6, %p1170_p13 }
 0x216   : > { %p794_p0 = por %p793_p11, %p792_p12 }
 0x217   : > { %p790_p4 = pneg %p789_p8 }
 0x218   : > { %p796_p3 = por %p795_p10, %p794_p0 }
 0x21a   : > { %p797_p7 = pnand %p796_p3, %p790_p4 }
 0x21c   : > { %800 = shalt.err (!%p797_p7)
}
 0x21d   : > { %624 = dma.vmem_to_hbm [thread:$0]  (%p1170_p13), %s1100_s7, 128, %s1098_s18, %s452_s10  }
 0x21e PF: > { %s477_s16 = sand.u32 1, %s835_s21   ;;  %p1171_p9 = scmp.ne.s32.totalorder %s1158_s28, 0 }
 0x21f   : > { %p1172_p2 = scmp.ge.s32.totalorder %s847_s24, 2  ;;  %s478_s20 = scalar_lea.sflag [#allocation4], %s477_s16 }
 0x221   : > { %p638_p5 = pnand %p1172_p2, %p1171_p9 }
 0x223   : > { %830 = dma.done.wait (!%p638_p5), %s478_s20, 128  }
 0x224   : > { %832 = vsyncadd (!%p638_p5), %s478_s20, 4294967168  ;;  %s1173_s23 = sld [smem:[#allocation13_spill]]  ;;  %s1174_s17 = sld [smem:[#allocation14_spill]] }
 0x225   : > { %p22_p1 = scmp.ge.s32.totalorder %s949_s9, 4   ;;  %s1175_s21 = smov %s839_s22 }
 0x226   : > { %s1178_s24 = smov %s949_s9 }
 0x227   :  { %24 = sbr.rel (!%p22_p1) target bundleno = 9 (0x9), region = 106 }
 0x22a   : > { %s1176_s22 = smov %s1173_s23  ;;  %s1177_s23 = smov %s1174_s17 }
 0x22e   :  { %483 = vsyncpa [#allocation3], 1 }
 0x22f   :  { %485 = vsyncpa [#allocation3 + $0x1], 1 }
 0x230   :  { %486 = vsyncpa [#allocation6], 1 }
 0x231   :  { %488 = vsyncpa [#allocation6 + $0x1], 1 }
 0x232   :  { %489 = vsyncpa [#allocation4], 1 }
 0x233   :  { %491 = vsyncpa [#allocation4 + $0x1], 1 }

</bundles_post_ra>
